<compile_context>
chip_gen: v7x
topology: tpu7x:2x2x1
jax: 0.10.0
libtpu: 0.0.40
codegen_flags: <defaults>
</compile_context>

<pallas_src>
import jax
import jax.numpy as jnp
from jax import lax
from jax.experimental import pallas as pl
from jax.experimental.pallas import tpu as pltpu


def _energy_mlp_kernel(s_ref, a_ref, w1s_ref, w1a_ref, b1_ref, w2_ref, b2_ref,
                       w3_ref, b3_ref, o_ref):
    """3-layer MLP on one batch tile, computed transposed (features x batch).

    s_ref : (tb, s_dim)  batch-major state tile
    a_ref : (tb, a_dim)  batch-major action tile
    w1s/w1a: (H, s_dim)/(H, a_dim)  layer-1 weight, pre-split (fused concat) & transposed
    b1/b2 : (H, 1)       bias columns (broadcast across the batch/lane axis)
    w2    : (H, H)       layer-2 weight, transposed
    w3    : (H, 1)       layer-3 weight column (used on VPU, not MXU)
    b3    : (1, 1)       scalar bias in SMEM
    o_ref : (1, tb)      lane-dense energies for this tile
    """
    nt = (((1,), (1,)), ((), ()))  # contract feature dims: lhs @ rhs.T (MXU-native "NT")

    # Layer 1 (concat fused: x @ W1 == state @ W1[:s] + action @ W1[s:]), transposed form.
    h = lax.dot_general(w1s_ref[...], s_ref[...], nt, preferred_element_type=jnp.float32)
    h += lax.dot_general(w1a_ref[...], a_ref[...], nt, preferred_element_type=jnp.float32)
    h = jnp.maximum(h + b1_ref[...], 0.0)                      # (H, tb), f32

    # Layer 2.
    h = jnp.dot(w2_ref[...], h.astype(w2_ref.dtype), preferred_element_type=jnp.float32)
    h = jnp.maximum(h + b2_ref[...], 0.0)                      # (H, tb), f32

    # Layer 3 (output width 1): VPU multiply + sublane reduce; result is already a
    # lane-dense (1, tb) row, so the store path uses full-width vst.
    e = jnp.sum(h * w3_ref[...], axis=0, keepdims=True) + b3_ref[0, 0]
    o_ref[...] = e.astype(o_ref.dtype)


def demo_energy_model_forward(state, action, params, *, tb=None,
                              compute_dtype=jnp.float32):
    """Pallas equivalent of Demo_EnergyModel.forward(state, action) -> (B, 1).

    compute_dtype: matmul-input dtype. jnp.bfloat16 is recommended on v6e/v7x (accumulation
    stays f32); keep f32 on v5e or when bit-tight accuracy is required.
    """
    B, s_dim = state.shape
    a_dim = action.shape[1]
    if tb is None:
        # Big batch tiles amortize the ~0.35us/grid-step overhead; 512 keeps the tile a
        # multiple of 128 and >= 2 tiles for large B (v7x megacore sharding).
        tb = B if B <= 512 else 512

    w1, b1 = params["w1"], params["b1"]            # (s_dim + a_dim, H), (1, H)
    w2, b2 = params["w2"], params["b2"]            # (H, H),             (1, H)
    w3, b3 = params["w3"], params["b3"]            # (H, 1),             (1, 1)
    H = w1.shape[1]

    # One-time (tiny) weight re-layouts: split W1 to fuse the concat; transpose so the
    # kernel computes with the batch on the lane axis. Biases/w3 stay f32 (VPU path).
    w1s_t = jnp.transpose(w1[:s_dim]).astype(compute_dtype)    # (H, s_dim)
    w1a_t = jnp.transpose(w1[s_dim:]).astype(compute_dtype)    # (H, a_dim)
    w2_t = jnp.transpose(w2).astype(compute_dtype)             # (H, H)
    b1_c = jnp.reshape(b1, (H, 1)).astype(jnp.float32)
    b2_c = jnp.reshape(b2, (H, 1)).astype(jnp.float32)
    w3_c = jnp.reshape(w3, (H, 1)).astype(jnp.float32)
    b3_s = jnp.reshape(b3, (1, 1)).astype(jnp.float32)

    state_c = state.astype(compute_dtype)
    action_c = action.astype(compute_dtype)

    grid = (pl.cdiv(B, tb),)
    out_row = pl.pallas_call(
        _energy_mlp_kernel,
        out_shape=jax.ShapeDtypeStruct((1, B), jnp.float32),   # lane-dense energies
        grid_spec=pltpu.PrefetchScalarGridSpec(
            num_scalar_prefetch=0,
            grid=grid,
            in_specs=[
                pl.BlockSpec((tb, s_dim), lambda i: (i, 0)),   # state: tiled over batch
                pl.BlockSpec((tb, a_dim), lambda i: (i, 0)),   # action: tiled over batch
                pl.BlockSpec((H, s_dim), lambda i: (0, 0)),    # w1_s^T: resident (no re-DMA)
                pl.BlockSpec((H, a_dim), lambda i: (0, 0)),    # w1_a^T: resident
                pl.BlockSpec((H, 1), lambda i: (0, 0)),        # b1 column
                pl.BlockSpec((H, H), lambda i: (0, 0)),        # w2^T
                pl.BlockSpec((H, 1), lambda i: (0, 0)),        # b2 column
                pl.BlockSpec((H, 1), lambda i: (0, 0)),        # w3 column
                pl.BlockSpec(memory_space=pltpu.MemorySpace.SMEM),  # b3 scalar in SMEM
            ],
            out_specs=pl.BlockSpec((1, tb), lambda i: (0, i)),
        ),
        compiler_params=pltpu.CompilerParams(
            dimension_semantics=("parallel",),
        ),
    )(state_c, action_c, w1s_t, w1a_t, b1_c, w2_t, b2_c, w3_c, b3_s)

    # Layout plumbing back to the PyTorch-style (B, 1) output.
    return jnp.reshape(out_row, (B, 1))


def init_params(key, state_dim, action_dim, hidden_dim=32):
    d_in = state_dim + action_dim
    k1, k2, k3, k4, k5, k6 = jax.random.split(key, 6)

    def u(k, shape, fan_in):
        bound = 1.0 / jnp.sqrt(fan_in)
        return jax.random.uniform(k, shape, jnp.float32, -bound, bound)

    return {
        "w1": u(k1, (d_in, hidden_dim), d_in),
        "b1": u(k2, (1, hidden_dim), d_in),
        "w2": u(k3, (hidden_dim, hidden_dim), hidden_dim),
        "b2": u(k4, (1, hidden_dim), hidden_dim),
        "w3": u(k5, (hidden_dim, 1), hidden_dim),
        "b3": u(k6, (1, 1), hidden_dim),
    }


def reference_forward(state, action, params):
    x = jnp.concatenate([state, action], axis=-1).astype(jnp.float32)
    h1 = jnp.maximum(x @ params["w1"] + params["b1"], 0.0)
    h2 = jnp.maximum(h1 @ params["w2"] + params["b2"], 0.0)
    return h2 @ params["w3"] + params["b3"]


if __name__ == "__main__":
    key = jax.random.PRNGKey(0)
    k_s, k_a, k_p = jax.random.split(key, 3)

    batch, state_dim, action_dim, hidden_dim = 16, 12, 4, 32
    state = jax.random.normal(k_s, (batch, state_dim), jnp.float32)
    action = jax.random.normal(k_a, (batch, action_dim), jnp.float32)
    params = init_params(k_p, state_dim, action_dim, hidden_dim)

    ref = reference_forward(state, action, params)

    # f32 path (tight check).
    out = demo_energy_model_forward(state, action, params)
    out = jax.block_until_ready(out)
    assert out.shape == (batch, 1)
    assert jnp.allclose(out, ref, atol=1e-5, rtol=1e-5), "f32 mismatch vs reference"

    # bf16 matmul-input path (recommended for v6e/v7x; f32 accumulation) — looser check.
    out_bf16 = demo_energy_model_forward(state, action, params,
                                         compute_dtype=jnp.bfloat16)
    out_bf16 = jax.block_until_ready(out_bf16)
    assert out_bf16.shape == (batch, 1)
    assert jnp.allclose(out_bf16, ref, atol=1e-1, rtol=1e-1), "bf16 mismatch vs reference"

    print("KERNEL_OK")
</pallas_src>

<mosaic_0001>
module attributes {stable_mosaic.version = 11 : i64} {
  func.func @_energy_mlp_kernel(%arg0: i32, %arg1: memref<16x12xf32, #tpu.memory_space<vmem>>, %arg2: memref<16x4xf32, #tpu.memory_space<vmem>>, %arg3: memref<32x12xf32, #tpu.memory_space<vmem>>, %arg4: memref<32x4xf32, #tpu.memory_space<vmem>>, %arg5: memref<32x1xf32, #tpu.memory_space<vmem>>, %arg6: memref<32x32xf32, #tpu.memory_space<vmem>>, %arg7: memref<32x1xf32, #tpu.memory_space<vmem>>, %arg8: memref<32x1xf32, #tpu.memory_space<vmem>>, %arg9: memref<1x1xf32, #tpu.memory_space<smem>>, %arg10: memref<1x16xf32, #tpu.memory_space<vmem>>) attributes {dimension_semantics = [#tpu.dimension_semantics<parallel>], iteration_bounds = array<i64: 1>, scalar_prefetch = 0 : i64, scratch_operands = 0 : i64, tpu.core_type = #tpu.core_type<tc>, window_params = [{transform_indices = @transform_0, window_bounds = array<i64: 16, 12>}, {transform_indices = @transform_1, window_bounds = array<i64: 16, 4>}, {pipeline_mode = #tpu.pipeline_mode<synchronous>, transform_indices = @transform_2, window_bounds = array<i64: 32, 12>}, {pipeline_mode = #tpu.pipeline_mode<synchronous>, transform_indices = @transform_3, window_bounds = array<i64: 32, 4>}, {pipeline_mode = #tpu.pipeline_mode<synchronous>, transform_indices = @transform_4, window_bounds = array<i64: 32, 1>}, {pipeline_mode = #tpu.pipeline_mode<synchronous>, transform_indices = @transform_5, window_bounds = array<i64: 32, 32>}, {pipeline_mode = #tpu.pipeline_mode<synchronous>, transform_indices = @transform_6, window_bounds = array<i64: 32, 1>}, {pipeline_mode = #tpu.pipeline_mode<synchronous>, transform_indices = @transform_7, window_bounds = array<i64: 32, 1>}, {transform_indices = @transform_8, window_bounds = array<i64: 1, 1>}, {transform_indices = @transform_9, window_bounds = array<i64: 1, 16>}]} {
    %c0 = arith.constant 0 : index
    %c0_0 = arith.constant 0 : index
    %0 = vector.load %arg3[%c0, %c0_0] : memref<32x12xf32, #tpu.memory_space<vmem>>, vector<32x12xf32>
    %c0_1 = arith.constant 0 : index
    %c0_2 = arith.constant 0 : index
    %1 = vector.load %arg1[%c0_1, %c0_2] : memref<16x12xf32, #tpu.memory_space<vmem>>, vector<16x12xf32>
    %cst = arith.constant dense<0.000000e+00> : vector<32x16xf32>
    %2 = tpu.matmul %0, %1, %cst {dimension_numbers = #tpu.dot_dimension_numbers<[1], [1], [0], [0], [0, 0, 1, 0], [], []>} : vector<32x12xf32>, vector<16x12xf32>, vector<32x16xf32> -> vector<32x16xf32>
    %c0_3 = arith.constant 0 : index
    %c0_4 = arith.constant 0 : index
    %3 = vector.load %arg4[%c0_3, %c0_4] : memref<32x4xf32, #tpu.memory_space<vmem>>, vector<32x4xf32>
    %c0_5 = arith.constant 0 : index
    %c0_6 = arith.constant 0 : index
    %4 = vector.load %arg2[%c0_5, %c0_6] : memref<16x4xf32, #tpu.memory_space<vmem>>, vector<16x4xf32>
    %cst_7 = arith.constant dense<0.000000e+00> : vector<32x16xf32>
    %5 = tpu.matmul %3, %4, %cst_7 {dimension_numbers = #tpu.dot_dimension_numbers<[1], [1], [0], [0], [0, 0, 1, 0], [], []>} : vector<32x4xf32>, vector<16x4xf32>, vector<32x16xf32> -> vector<32x16xf32>
    %6 = arith.addf %2, %5 : vector<32x16xf32>
    %c0_8 = arith.constant 0 : index
    %c0_9 = arith.constant 0 : index
    %7 = vector.load %arg5[%c0_8, %c0_9] : memref<32x1xf32, #tpu.memory_space<vmem>>, vector<32x1xf32>
    %8 = vector.broadcast %7 : vector<32x1xf32> to vector<32x16xf32>
    %9 = arith.addf %6, %8 : vector<32x16xf32>
    %cst_10 = arith.constant 0.000000e+00 : f32
    %10 = vector.broadcast %cst_10 : f32 to vector<32x16xf32>
    %11 = arith.maximumf %9, %10 : vector<32x16xf32>
    %c0_11 = arith.constant 0 : index
    %c0_12 = arith.constant 0 : index
    %12 = vector.load %arg6[%c0_11, %c0_12] : memref<32x32xf32, #tpu.memory_space<vmem>>, vector<32x32xf32>
    %cst_13 = arith.constant dense<0.000000e+00> : vector<32x16xf32>
    %13 = tpu.matmul %12, %11, %cst_13 {dimension_numbers = #tpu.dot_dimension_numbers<[1], [0], [0], [1], [0, 0, 1, 1], [], []>} : vector<32x32xf32>, vector<32x16xf32>, vector<32x16xf32> -> vector<32x16xf32>
    %c0_14 = arith.constant 0 : index
    %c0_15 = arith.constant 0 : index
    %14 = vector.load %arg7[%c0_14, %c0_15] : memref<32x1xf32, #tpu.memory_space<vmem>>, vector<32x1xf32>
    %15 = vector.broadcast %14 : vector<32x1xf32> to vector<32x16xf32>
    %16 = arith.addf %13, %15 : vector<32x16xf32>
    %cst_16 = arith.constant 0.000000e+00 : f32
    %17 = vector.broadcast %cst_16 : f32 to vector<32x16xf32>
    %18 = arith.maximumf %16, %17 : vector<32x16xf32>
    %c0_17 = arith.constant 0 : index
    %c0_18 = arith.constant 0 : index
    %19 = vector.load %arg8[%c0_17, %c0_18] : memref<32x1xf32, #tpu.memory_space<vmem>>, vector<32x1xf32>
    %20 = vector.broadcast %19 : vector<32x1xf32> to vector<32x16xf32>
    %21 = arith.mulf %18, %20 : vector<32x16xf32>
    %cst_19 = arith.constant dense<0.000000e+00> : vector<16xf32>
    %22 = vector.multi_reduction <add>, %21, %cst_19 [0] : vector<32x16xf32> to vector<16xf32>
    %23 = vector.shape_cast %22 : vector<16xf32> to vector<1x16xf32>
    %c0_20 = arith.constant 0 : index
    %c0_21 = arith.constant 0 : index
    %24 = memref.load %arg9[%c0_20, %c0_21] : memref<1x1xf32, #tpu.memory_space<smem>>
    %25 = vector.broadcast %24 : f32 to vector<1x16xf32>
    %26 = arith.addf %23, %25 : vector<1x16xf32>
    %c0_22 = arith.constant 0 : index
    %c0_23 = arith.constant 0 : index
    %27 = vector.load %arg10[%c0_22, %c0_23] : memref<1x16xf32, #tpu.memory_space<vmem>>, vector<1x16xf32>
    tpu.vector_store %arg10[%c0_22, %c0_23], %26 {strides = array<i32>} : memref<1x16xf32, #tpu.memory_space<vmem>>, vector<1x16xf32>,
    return
  }
  func.func @transform_0(%arg0: i32) -> (i32, i32) {
    %c0_i32 = arith.constant 0 : i32
    %c0_i32_0 = arith.constant 0 : i32
    return %arg0, %c0_i32 : i32, i32
  }
  func.func @transform_1(%arg0: i32) -> (i32, i32) {
    %c0_i32 = arith.constant 0 : i32
    %c0_i32_0 = arith.constant 0 : i32
    return %arg0, %c0_i32 : i32, i32
  }
  func.func @transform_2(%arg0: i32) -> (i32, i32) {
    %c0_i32 = arith.constant 0 : i32
    %c0_i32_0 = arith.constant 0 : i32
    %c0_i32_1 = arith.constant 0 : i32
    return %c0_i32, %c0_i32_0 : i32, i32
  }
  func.func @transform_3(%arg0: i32) -> (i32, i32) {
    %c0_i32 = arith.constant 0 : i32
    %c0_i32_0 = arith.constant 0 : i32
    %c0_i32_1 = arith.constant 0 : i32
    return %c0_i32, %c0_i32_0 : i32, i32
  }
  func.func @transform_4(%arg0: i32) -> (i32, i32) {
    %c0_i32 = arith.constant 0 : i32
    %c0_i32_0 = arith.constant 0 : i32
    %c0_i32_1 = arith.constant 0 : i32
    return %c0_i32, %c0_i32_0 : i32, i32
  }
  func.func @transform_5(%arg0: i32) -> (i32, i32) {
    %c0_i32 = arith.constant 0 : i32
    %c0_i32_0 = arith.constant 0 : i32
    %c0_i32_1 = arith.constant 0 : i32
    return %c0_i32, %c0_i32_0 : i32, i32
  }
  func.func @transform_6(%arg0: i32) -> (i32, i32) {
    %c0_i32 = arith.constant 0 : i32
    %c0_i32_0 = arith.constant 0 : i32
    %c0_i32_1 = arith.constant 0 : i32
    return %c0_i32, %c0_i32_0 : i32, i32
  }
  func.func @transform_7(%arg0: i32) -> (i32, i32) {
    %c0_i32 = arith.constant 0 : i32
    %c0_i32_0 = arith.constant 0 : i32
    %c0_i32_1 = arith.constant 0 : i32
    return %c0_i32, %c0_i32_0 : i32, i32
  }
  func.func @transform_8(%arg0: i32) -> (i32, i32) {
    %c0_i32 = arith.constant 0 : i32
    %c0_i32_0 = arith.constant 0 : i32
    %c0_i32_1 = arith.constant 0 : i32
    return %c0_i32, %c0_i32_0 : i32, i32
  }
  func.func @transform_9(%arg0: i32) -> (i32, i32) {
    %c0_i32 = arith.constant 0 : i32
    %c0_i32_0 = arith.constant 0 : i32
    return %c0_i32, %arg0 : i32, i32
  }
}

</mosaic_0001>

<bundles_post_ra>
// kernel: tpu_custom_call.1
= control target key start
LH: loop header
LB: loop body
LE: loop exit
PB: predicated region body
PF: predicated region fallthrough
CT: control target
= control target key end

     0   :  { %vm46_vm0 = vcmask 31744   ;;  %vm150_vm1 = vcmask 97280   ;;  %v599_v5 = vmov 0   ;;  %s778_s0 = inlined_call_operand.vmem [shape: f32[16,12], index: 0, kind: input, shape index: {}]   ;;  %s779_s1 = inlined_call_operand.vmem [shape: f32[16,4], index: 1, kind: input, shape index: {}]   ;;  %s780_s2 = inlined_call_operand.vmem [shape: f32[32,12], index: 2, kind: input, shape index: {}]   ;;  %s781_s3 = inlined_call_operand.vmem [shape: f32[32,4], index: 3, kind: input, shape index: {}]   ;;  %s782_s4 = inlined_call_operand.vmem [shape: f32[32,1], index: 4, kind: input, shape index: {}]   ;;  %s783_s5 = inlined_call_operand.vmem [shape: f32[32,32], index: 5, kind: input, shape index: {}]   ;;  %s784_s6 = inlined_call_operand.vmem [shape: f32[32,1], index: 6, kind: input, shape index: {}]   ;;  %s785_s7 = inlined_call_operand.vmem [shape: f32[32,1], index: 7, kind: input, shape index: {}]   ;;  %s786_s8 = inlined_call_operand.<no memory space> [shape: f32[1,1], index: 8, kind: input, shape index: {}]   ;;  %s787_s9 = inlined_call_operand.hbm [shape: f32[1,16], index: 9, kind: output, shape index: {}]  }
   0x1   :  { %v44_v0 = vld [vmem:[%s779_s1] sm:$0xff]  ;;  %v45_v1 = vld [vmem:[%s779_s1 + $0x8] sm:$0xff]  ;;  %vm548_vm2 = vmpackc.low %vm46_vm0, %vm46_vm0  ;;  %573 = vset.pattern.permute.xlu0 %v599_v5  ;;  %574 = vset.pattern.permute.xlu1 %v599_v5 }
   0x2   :  { %v40_v2 = vld [vmem:[%s781_s3] sm:$0xff]  ;;  %v547_v3 = vpack.c.bf16 %v45_v1, %v44_v0  ;;  %v39_v6 = vld [vmem:[%s778_s0 + $0x8] sm:$0xff]  ;;  %vm671_vm3 = vmpackc.low %vm150_vm1, %vm150_vm1 }
   0x3   :  { %517 = vmatprep.mubr.msk.f32.mxu0 %vm46_vm0, %v40_v2  ;;  %v38_v4 = vld [vmem:[%s778_s0] sm:$0xff]  ;;  %v256_v10 = vld [vmem:[%s782_s4 + $0x10] sm:$0xff]  ;;  %v255_v11 = vld [vmem:[%s782_s4 + $0x8] sm:$0xff] }
   0x4   :  { %549 = vmatprep.subr.msk.bf16.mxu0 %vm548_vm2, %v547_v3  ;;  %v553_v8 = vpack.c.bf16 %v39_v6, %v38_v4  ;;  %v254_v9 = vld [vmem:[%s782_s4] sm:$0xff]  ;;  %270 = vperm.xlu1 %574, %v256_v10   ;;  %v257_v12 = vld [vmem:[%s782_s4 + $0x18] sm:$0xff]  ;;  %v41_v13 = vld [vmem:[%s781_s3 + $0x8] sm:$0xff] }
   0x5   :  { %552 = vmatpush3.bf16.xpose.msk.msra.mxu0 %vm548_vm2, %v547_v3  ;;  %260 = vperm.xlu0 %573, %v254_v9  }
   0x6   :  { %555 = vmatprep.subr.msk.bf16.mxu0 %vm671_vm3, %v553_v8 }
   0x7   :  { %15 = vsyncpa [#allocation4], 0  ;;  %v42_v14 = vld [vmem:[%s781_s3 + $0x10] sm:$0xff]  ;;  %v290_v15 = vld [vmem:[%s784_s6] sm:$0xff]  ;;  %vm314_vm4 = vcmask 261120   ;;  %vm444_vm5 = vcmask 130048  }
   0x8   :  { %275 = vperm.xlu1 %574, %v257_v12   ;;  %v291_v16 = vld [vmem:[%s784_s6 + $0x8] sm:$0xff]  ;;  %v43_v17 = vld [vmem:[%s781_s3 + $0x18] sm:$0xff]  ;;  %v34_v18 = vld [vmem:[%s780_s2] sm:$0xff]  ;;  %s600_s14 = smov [#allocation3]   ;;  %vm461_vm6 = vcmask 122880  }
   0x9   :  { %265 = vperm.xlu0 %573, %v255_v11   ;;  %v292_v19 = vld [vmem:[%s784_s6 + $0x10] sm:$0xff]  ;;  %v293_v20 = vld [vmem:[%s784_s6 + $0x18] sm:$0xff]  ;;  %v35_v21 = vld [vmem:[%s780_s2 + $0x8] sm:$0xff]  ;;  %s469_s15 = sshll.u32 %s600_s14, 4  ;;  %s470_s15 = int_to_ptr.vmem [resolvable:$true] %s469_s15 }
   0xa   :  { %v36_v22 = vld [vmem:[%s780_s2 + $0x10] sm:$0xff]  ;;  %v416_v23 = vld [vmem:[%s785_s7] sm:$0xff]  ;;  %v417_v24 = vld [vmem:[%s785_s7 + $0x8] sm:$0xff]  ;;  %s575_s16 = scalar_lea.vmem %s470_s15, 16  ;;  %s579_s17 = scalar_lea.vmem %s470_s15, 32 }
   0xb   :  { %v37_v25 = vld [vmem:[%s780_s2 + $0x18] sm:$0xff]  ;;  %v418_v26 = vld [vmem:[%s785_s7 + $0x10] sm:$0xff]  ;;  %v286_v28 = vld [vmem:[%s783_s5] sm:$0xff]  ;;  %p576_p0 = scmp.ne.s32.totalorder %s470_s15, %s575_s16  ;;  %p580_p1 = scmp.lt.s32.totalorder %s470_s15, %s470_s15 }
   0xc   :  { %518 = vmatmul.mubr.msk.f32.vlgmr.msra.gmra.mrb[0].mxu0 %vm46_vm0, %v41_v13  ;;  %301 = vperm.xlu1 %574, %v291_v16   ;;  %v419_v27 = vld [vmem:[%s785_s7 + $0x18] sm:$0xff]  ;;  %v287_v47 = vld [vmem:[%s783_s5 + $0x8] sm:$0xff]  ;;  %v288_v48 = vld [vmem:[%s783_s5 + $0x10] sm:$0xff]  ;;  %p581_p2 = scmp.lt.s32.totalorder %s579_s17, %s575_s16 }
   0xd   :  { %558 = vmatpush3.bf16.xpose.msk.msra.mxu0 %vm671_vm3, %v553_v8  ;;  %520 = vmatprep.mubr.msk.f32.mxu0 %vm46_vm0, %v42_v14  ;;  %v289_v49 = vld [vmem:[%s783_s5 + $0x18] sm:$0xff] }
   0xe   :  { %296 = vperm.xlu0 %573, %v290_v15   ;;  %541 = vmatprep.mubr.msk.f32.mxu1 %vm314_vm4, %v286_v28  ;;  %p582_p3 = por %p581_p2, %p580_p1 }
  0x10   :  { %521 = vmatmul.mubr.msk.f32.gmra.mrb[2].mxu0 %vm46_vm0, %v43_v17  ;;  %311 = vperm.xlu1 %574, %v293_v20   ;;  %p583_p4 = pnand %p582_p3, %p576_p0 }
  0x11   :  { %527 = vmatprep.mubr.msk.f32.mxu0 %vm150_vm1, %v34_v18 }
  0x12   :  { %306 = vperm.xlu0 %573, %v292_v19  }
  0x14   :  { %528 = vmatmul.mubr.msk.f32.vlgmr.msra.gmra.mrb[0].mxu0 %vm150_vm1, %v35_v21  ;;  %427 = vperm.xlu1 %574, %v417_v24  }
  0x15   :  { %530 = vmatprep.mubr.msk.f32.mxu0 %vm150_vm1, %v36_v22  ;;  %v459_v22 = vstv %s786_s8 }
  0x16   :  { %422 = vperm.xlu0 %573, %v416_v23  }
  0x18   :  { %531 = vmatmul.mubr.msk.f32.gmra.mrb[2].mxu0 %vm150_vm1, %v37_v25  ;;  %437 = vperm.xlu1 %574, %v419_v27  }
  0x1a   :  { %432 = vperm.xlu0 %573, %v418_v26  }
  0x83   :  { %v271_v30 = vpop.permute.xlu1 %270 }
  0x84   :  { %v261_v29 = vpop.permute.xlu0 %260 }
  0x87   :  { %v276_v37 = vpop.permute.xlu1 %275 }
  0x88   :  { %v266_v31 = vpop.permute.xlu0 %265 }
  0x8b   :  { %v302_v51 = vpop.permute.xlu1 %301 }
  0x8d   :  { %v297_v50 = vpop.permute.xlu0 %296 }
  0x8f   :  { %v312_v53 = vpop.permute.xlu1 %311 }
  0x91   :  { %v307_v52 = vpop.permute.xlu0 %306 }
  0x93   :  { %v428_v59 = vpop.permute.xlu1 %427 }
  0x95   :  { %v423_v58 = vpop.permute.xlu0 %422 }
  0x97   :  { %v438_v9 = vpop.permute.xlu1 %437 }
  0x99   :  { %v433_v8 = vpop.permute.xlu0 %432 }
  0xe7   :  { %v529_v32 = vpop.f32.mrb[0].mxu0 }
  0xe8   :  { %v279_v33 = vadd.f32 %v529_v32, %v266_v31  ;;  %v235_v34 = vpop.f32.mrb[1].mxu0 }
  0xe9   :  { %v278_v35 = vadd.f32 %v261_v29, %v235_v34 }
  0xea   :  { %v283_v36 = vmax.f32 %v279_v33, 0.0 }
  0xeb   :  { %v282_v38 = vmax.f32 %v278_v35, 0.0  ;;  %v532_v39 = vpop.f32.mrb[2].mxu0 }
  0xec   :  { %v281_v40 = vadd.f32 %v532_v39, %v276_v37  ;;  %v245_v41 = vpop.f32.mrb[3].mxu0 }
  0xed   :  { %v280_v42 = vadd.f32 %v271_v30, %v245_v41  ;;  %v559_v43 = vpack.c.bf16 %v283_v36, %v282_v38 }
  0xee   :  { %v285_v44 = vmax.f32 %v281_v40, 0.0 }
  0xef   :  { %v284_v45 = vmax.f32 %v280_v42, 0.0  ;;  %560 = vmatprep.subr.bf16.mxu1 %v559_v43 }
  0xf0   :  { %562 = vmatpush3.bf16.msra.mxu1 %v559_v43 }
  0xf1   :  { %v563_v46 = vpack.c.bf16 %v285_v44, %v284_v45 }
  0xf3   :  { %564 = vmatprep.subr.bf16.mxu1 %v563_v46 }
  0xf4   :  { %566 = vmatpush3.bf16.msra.mxu1 %v563_v46 }
  0xf7   :  { %542 = vmatmul.mubr.msk.f32.vlgmr.msra.gmra.mrb[0].mxu1 %vm314_vm4, %v287_v47 }
  0xf8   :  { %544 = vmatprep.mubr.msk.f32.mxu1 %vm314_vm4, %v288_v48 }
  0xfb   :  { %545 = vmatmul.mubr.msk.f32.gmra.mrb[2].mxu1 %vm314_vm4, %v289_v49 }
 0x1ca   :  { %v543_v54 = vpop.f32.mrb[0].mxu1 }
 0x1cb   :  { %v399_v55 = vadd.f32 %v543_v54, %v302_v51  ;;  %v393_v56 = vpop.f32.mrb[1].mxu1 }
 0x1cc   :  { %v394_v57 = vadd.f32 %v393_v56, %v297_v50 }
 0x1cd   :  { %v413_v60 = vmax.f32 %v399_v55, 0.0 }
 0x1ce   :  { %v412_v61 = vmax.f32 %v394_v57, 0.0  ;;  %v546_v62 = vpop.f32.mrb[2].mxu1 }
 0x1cf   :  { %v441_v63 = vmul.f32 %v428_v59, %v413_v60  ;;  %v409_v0 = vadd.f32 %v546_v62, %v312_v53  ;;  %v403_v1 = vpop.f32.mrb[3].mxu1 }
 0x1d0   :  { %v440_v2 = vmul.f32 %v423_v58, %v412_v61  ;;  %v404_v3 = vadd.f32 %v403_v1, %v307_v52 }
 0x1d1   :  { %v446_v4 = vsel %vm444_vm5, %v441_v63, 0.0  ;;  %v415_v5 = vmax.f32 %v409_v0, 0.0 }
 0x1d2   :  { %v445_v6 = vsel %vm444_vm5, %v440_v2, 0.0  ;;  %v414_v7 = vmax.f32 %v404_v3, 0.0 }
 0x1d3   :  { %v447_v10 = vadd.f32 %v446_v4, %v445_v6  ;;  %v443_v11 = vmul.f32 %v438_v9, %v415_v5 }
 0x1d4   :  { %v442_v12 = vmul.f32 %v433_v8, %v414_v7 }
 0x1d5   :  { %v450_v15 = vsel %vm444_vm5, %v443_v11, 0.0 }
 0x1d6   :  { %v448_v13 = vsel %vm444_vm5, %v442_v12, 0.0 }
 0x1d7   :  { %v449_v14 = vadd.f32 %v448_v13, %v447_v10 }
 0x1d9   :  { %v451_v16 = vadd.f32 %v450_v15, %v449_v14 }
 0x1db   :  { %v452_v17 = vrot.slane %v451_v16, 4 }
 0x1dd   :  { %v453_v18 = vadd.f32 %v452_v17, %v451_v16 }
 0x1df   :  { %v454_v19 = vrot.slane %v453_v18, 2 }
 0x1e1   :  { %v455_v20 = vadd.f32 %v454_v19, %v453_v18 }
 0x1e3   :  { %v456_v21 = vrot.slane %v455_v20, 1 }
 0x1e5   :  { %v457_v23 = vadd.f32 %v456_v21, %v455_v20 }
 0x1e7   :  { %v460_v24 = vadd.f32 %v459_v22, %v457_v23 }
 0x1e9   :  { %462 = vst.msk [vmem:[#allocation3] sm:$0x1] %vm461_vm6, %v460_v24 }
 0x1ea   :  { %586 = shalt.err (!%p583_p4)
}
 0x1eb   :  { %s587_s3 = scalar_lea.hbm %s787_s9, 16 }
 0x1ec   :  { %p588_p5 = scmp.ne.s32.totalorder %s787_s9, %s587_s3  ;;  %p591_p6 = scmp.lt.u32.totalorder %s587_s3, %s787_s9 }
 0x1ee   :  { %p593_p7 = pnand %p591_p6, %p588_p5 }
 0x1f0   :  { %596 = shalt.err (!%p593_p7)
}
 0x1f1   :  { %472 = dma.vmem_to_hbm [thread:$0]  %s470_s15, 16, %s787_s9, [#allocation4]  }
 0x1f2   :  { %597 = dma.done.wait [#allocation4], 16  }
 0x1f3   :  { %598 = vsyncadd [#allocation4], 4294967280 }
 0x1f4   :  { %476 = vsyncpa [#allocation4], 1 }

</bundles_post_ra>
